<compile_context>
chip_gen: v6e
topology: v6e:2x2x1
jax: 0.10.0
libtpu: 0.0.40
codegen_flags: <defaults>
</compile_context>

<pallas_src>
import functools

import jax
import jax.numpy as jnp
from jax import lax
from jax.experimental import pallas as pl
from jax.experimental.pallas import tpu as pltpu

Z_DIM = 128
HIDDEN_DIM = 128
BASE_LAYERS = 4
HEAD_NAMES = ("nerf_w0", "nerf_w1", "nerf_rgb")
LEAKY_SLOPE = 0.2
PIXELNORM_EPS = 1e-8


def _leaky_relu(x, slope=LEAKY_SLOPE):
    # slope < 1  =>  max(x, slope*x) == LeakyReLU(x); single VPU op.
    return jnp.maximum(x, slope * x)


def mapping_kernel(z_ref, w_ref, b_ref, out_ref):
    """PixelNorm + 4-layer MLP (LeakyReLU after layers 0..2) on one batch tile.

    z_ref : (TM, Z_DIM)                     f32
    w_ref : (BASE_LAYERS, Z_DIM, HIDDEN)    bf16 (stacked weights, one operand)
    b_ref : (BASE_LAYERS, 1, HIDDEN)        f32  (stacked biases, one operand)
    out   : (TM, HIDDEN)                    f32

    All ops are row-independent, so a ragged (out-of-bounds) last tile is safe:
    garbage OOB rows compute garbage that is never written back.
    """
    z = z_ref[...].astype(jnp.float32)

    # PixelNorm: z * rsqrt(mean(z**2, axis=1, keepdims=True) + 1e-8)
    ms = jnp.mean(z * z, axis=1, keepdims=True)
    h = z * lax.rsqrt(ms + PIXELNORM_EPS)

    # base_net: 3x (Linear + LeakyReLU) then Linear (no act; head_layers == 0).
    # bf16 operands, f32 accumulation on the MXU.
    for i in range(BASE_LAYERS):
        h = jnp.dot(h.astype(jnp.bfloat16), w_ref[i],
                    preferred_element_type=jnp.float32) + b_ref[i]
        if i != BASE_LAYERS - 1:
            h = _leaky_relu(h)

    out_ref[...] = h.astype(out_ref.dtype)


def init_params(key, z_dim=Z_DIM, hidden_dim=HIDDEN_DIM, base_layers=BASE_LAYERS):
    """Deterministic init matching the PyTorch module's shapes.

    Weights: kaiming_normal_(a=0.2, mode='fan_in', nonlinearity='leaky_relu')
             -> std = sqrt(2 / (1 + a^2)) / sqrt(fan_in)
    Biases:  PyTorch nn.Linear default -> U(-1/sqrt(fan_in), 1/sqrt(fan_in))
    Stored transposed as (in_dim, out_dim) for the (batch, feat) @ (in, out) layout.
    """
    params = []
    in_dim = z_dim
    gain = (2.0 / (1.0 + LEAKY_SLOPE ** 2)) ** 0.5
    for _ in range(base_layers):
        out_dim = hidden_dim
        key, kw, kb = jax.random.split(key, 3)
        std = gain / (in_dim ** 0.5)
        w = jax.random.normal(kw, (in_dim, out_dim), jnp.float32) * std
        bound = 1.0 / (in_dim ** 0.5)
        b = jax.random.uniform(kb, (1, out_dim), jnp.float32, -bound, bound)
        params.append((w, b))
        in_dim = out_dim
    return params


def prepare_params(params):
    """One-time stack + cast of the layer params (hoisted out of the forward path).

    Fails loudly on non-default shapes instead of producing a wrong stack.
    """
    assert len(params) == BASE_LAYERS, (
        f"expected {BASE_LAYERS} base layers, got {len(params)}")
    for li, (w, b) in enumerate(params):
        assert w.shape == (Z_DIM, HIDDEN_DIM), (
            f"layer {li}: weight shape {w.shape} != {(Z_DIM, HIDDEN_DIM)}")
        assert b.shape == (1, HIDDEN_DIM), (
            f"layer {li}: bias shape {b.shape} != {(1, HIDDEN_DIM)}")
    w_stack = jnp.stack([w for (w, _) in params]).astype(jnp.bfloat16)  # (4,128,128)
    b_stack = jnp.stack([b for (_, b) in params]).astype(jnp.float32)   # (4,1,128)
    return w_stack, b_stack


def _round_up(x, m):
    return ((int(x) + m - 1) // m) * m


def _num_tensorcores():
    """2 TensorCores per chip on v7x; 1 on v5e/v6e (and a safe default otherwise)."""
    try:
        kind = jax.devices()[0].device_kind.lower()
    except Exception:
        return 1
    return 2 if "v7" in kind else 1


def _choose_tile(batch, cap=2048, num_cores=None):
    """Pick the batch tile (multiple of 8 rows).

    1-TC chips (v5e/v6e): never split a batch just to manufacture grid steps --
      the grid is a serial loop there, so use one tile up to `cap`.
    2-TC chips (v7x): split only if each half-tile keeps >= 256 rows, and keep
      the grid length even so both cores stay busy on every pair of steps.
    """
    if num_cores is None:
        num_cores = _num_tensorcores()
    cap = max(8, _round_up(cap, 8))
    b8 = _round_up(max(int(batch), 1), 8)

    if num_cores <= 1:
        return min(b8, cap)

    if b8 < 2 * 256:          # too small to be worth splitting across cores
        return min(b8, cap)
    if b8 <= 2 * cap:         # exactly two tiles, one per core
        return _round_up(pl.cdiv(b8, 2), 8)
    grid = _round_up(pl.cdiv(b8, cap), 2)   # even grid length
    return _round_up(pl.cdiv(b8, grid), 8)


@functools.partial(jax.jit, static_argnames=("tile",))
def _mapping_base(z, w_stack, b_stack, *, tile):
    """Runs the fused kernel; returns the shared base feature (B, HIDDEN_DIM)."""
    B, zd = z.shape
    assert zd == Z_DIM
    grid = pl.cdiv(B, tile)   # ragged last block handled by Pallas (no pad/slice)

    return pl.pallas_call(
        mapping_kernel,
        out_shape=jax.ShapeDtypeStruct((B, HIDDEN_DIM), jnp.float32),
        grid_spec=pltpu.PrefetchScalarGridSpec(
            num_scalar_prefetch=0,
            grid=(grid,),
            in_specs=[
                pl.BlockSpec((tile, Z_DIM), lambda i: (i, 0)),
                pl.BlockSpec((BASE_LAYERS, Z_DIM, HIDDEN_DIM),
                             lambda i: (0, 0, 0)),
                pl.BlockSpec((BASE_LAYERS, 1, HIDDEN_DIM),
                             lambda i: (0, 0, 0)),
            ],
            out_specs=pl.BlockSpec((tile, HIDDEN_DIM), lambda i: (i, 0)),
        ),
        compiler_params=pltpu.CompilerParams(
            dimension_semantics=("parallel",)),
    )(z, w_stack, b_stack)


def multi_head_mapping_forward(z, prepared_params, batch_tile=2048):
    """Returns out_dict like the PyTorch module.

    head_layers == 0 -> every head is nn.Identity over the shared base feature;
    the fan-out happens outside jit so all three entries alias ONE device buffer.
    `prepared_params` is the (w_stack, b_stack) pair from prepare_params().
    """
    w_stack, b_stack = prepared_params
    tile = _choose_tile(z.shape[0], cap=batch_tile)
    base_fea = _mapping_base(z.astype(jnp.float32), w_stack, b_stack, tile=tile)
    return {name: base_fea for name in HEAD_NAMES}


def reference_forward_f32(z, params):
    """Pure-JAX f32 reference (highest matmul precision) mirroring PyTorch."""
    z = z.astype(jnp.float32)
    h = z * lax.rsqrt(jnp.mean(z * z, axis=1, keepdims=True) + PIXELNORM_EPS)
    for i, (w, b) in enumerate(params):
        h = jnp.dot(h, w, precision=lax.Precision.HIGHEST) + b
        if i != len(params) - 1:
            h = jnp.maximum(h, LEAKY_SLOPE * h)
    return h


def reference_forward_bf16(z, params):
    """Pure-JAX reference matching the kernel's numerics (bf16 ops, f32 accum)."""
    z = z.astype(jnp.float32)
    h = z * lax.rsqrt(jnp.mean(z * z, axis=1, keepdims=True) + PIXELNORM_EPS)
    for i, (w, b) in enumerate(params):
        h = jnp.dot(h.astype(jnp.bfloat16), w.astype(jnp.bfloat16),
                    preferred_element_type=jnp.float32) + b.astype(jnp.float32)
        if i != len(params) - 1:
            h = jnp.maximum(h, LEAKY_SLOPE * h)
    return h


if __name__ == "__main__":
    key = jax.random.PRNGKey(0)
    k_z, k_p = jax.random.split(key)

    # Small batch; 20 is NOT a multiple of 8 so the ragged-last-block path
    # (no wrapper pad/slice) is exercised.
    B = 20
    z = jax.random.normal(k_z, (B, Z_DIM), jnp.float32)
    params = init_params(k_p)
    prepared = prepare_params(params)   # one-time stack + bf16 cast (hoisted)

    out = multi_head_mapping_forward(z, prepared)
    jax.block_until_ready(out)

    ref_bf16 = reference_forward_bf16(z, params)   # kernel-numerics reference
    ref_f32 = reference_forward_f32(z, params)     # module-precision reference
    for name in HEAD_NAMES:
        o = out[name]
        assert o.shape == (B, HIDDEN_DIM)
        tight = float(jnp.max(jnp.abs(o - ref_bf16)))
        assert tight < 5e-2, f"{name}: max abs err vs bf16 ref {tight}"
        rel = float(jnp.linalg.norm(o - ref_f32) /
                    (jnp.linalg.norm(ref_f32) + 1e-12))
        assert rel < 5e-2, f"{name}: rel err vs f32 ref {rel}"

    print("KERNEL_OK")
</pallas_src>

<mosaic_0001>
module attributes {stable_mosaic.version = 11 : i64} {
  func.func @mapping_kernel(%arg0: i32, %arg1: memref<24x128xf32, #tpu.memory_space<vmem>>, %arg2: memref<4x128x128xbf16, #tpu.memory_space<vmem>>, %arg3: memref<4x1x128xf32, #tpu.memory_space<vmem>>, %arg4: memref<24x128xf32, #tpu.memory_space<vmem>>) attributes {dimension_semantics = [#tpu.dimension_semantics<parallel>], iteration_bounds = array<i64: 1>, scalar_prefetch = 0 : i64, scratch_operands = 0 : i64, tpu.core_type = #tpu.core_type<tc>, window_params = [{transform_indices = @transform_0, window_bounds = array<i64: 24, 128>}, {pipeline_mode = #tpu.pipeline_mode<synchronous>, transform_indices = @transform_1, window_bounds = array<i64: 4, 128, 128>}, {pipeline_mode = #tpu.pipeline_mode<synchronous>, transform_indices = @transform_2, window_bounds = array<i64: 4, 1, 128>}, {transform_indices = @transform_3, window_bounds = array<i64: 24, 128>}]} {
    %c0 = arith.constant 0 : index
    %c0_0 = arith.constant 0 : index
    %0 = vector.load %arg1[%c0, %c0_0] : memref<24x128xf32, #tpu.memory_space<vmem>>, vector<24x128xf32>
    %1 = arith.mulf %0, %0 : vector<24x128xf32>
    %cst = arith.constant dense<0.000000e+00> : vector<24xf32>
    %2 = vector.multi_reduction <add>, %1, %cst [1] : vector<24x128xf32> to vector<24xf32>
    %3 = vector.shape_cast %2 : vector<24xf32> to vector<24x1xf32>
    %cst_1 = arith.constant 1.280000e+02 : f32
    %4 = vector.broadcast %cst_1 : f32 to vector<24x1xf32>
    %5 = arith.divf %3, %4 : vector<24x1xf32>
    %cst_2 = arith.constant 9.99999993E-9 : f32
    %6 = vector.broadcast %cst_2 : f32 to vector<24x1xf32>
    %7 = arith.addf %5, %6 : vector<24x1xf32>
    %8 = math.rsqrt %7 : vector<24x1xf32>
    %9 = vector.broadcast %8 : vector<24x1xf32> to vector<24x128xf32>
    %10 = arith.mulf %0, %9 : vector<24x128xf32>
    %11 = arith.truncf %10 : vector<24x128xf32> to vector<24x128xbf16>
    %c0_3 = arith.constant 0 : index
    %c0_4 = arith.constant 0 : index
    %c0_5 = arith.constant 0 : index
    %12 = vector.load %arg2[%c0_3, %c0_4, %c0_5] : memref<4x128x128xbf16, #tpu.memory_space<vmem>>, vector<1x128x128xbf16>
    %13 = vector.shape_cast %12 : vector<1x128x128xbf16> to vector<128x128xbf16>
    %cst_6 = arith.constant dense<0.000000e+00> : vector<24x128xf32>
    %14 = tpu.matmul %11, %13, %cst_6 {dimension_numbers = #tpu.dot_dimension_numbers<[1], [0], [0], [1], [0, 0, 1, 1], [], []>} : vector<24x128xbf16>, vector<128x128xbf16>, vector<24x128xf32> -> vector<24x128xf32>
    %c0_7 = arith.constant 0 : index
    %c0_8 = arith.constant 0 : index
    %c0_9 = arith.constant 0 : index
    %15 = vector.load %arg3[%c0_7, %c0_8, %c0_9] : memref<4x1x128xf32, #tpu.memory_space<vmem>>, vector<1x1x128xf32>
    %16 = vector.shape_cast %15 : vector<1x1x128xf32> to vector<1x128xf32>
    %17 = vector.broadcast %16 : vector<1x128xf32> to vector<24x128xf32>
    %18 = arith.addf %14, %17 : vector<24x128xf32>
    %cst_10 = arith.constant 2.000000e-01 : f32
    %19 = vector.broadcast %cst_10 : f32 to vector<24x128xf32>
    %20 = arith.mulf %19, %18 : vector<24x128xf32>
    %21 = arith.maximumf %18, %20 : vector<24x128xf32>
    %22 = arith.truncf %21 : vector<24x128xf32> to vector<24x128xbf16>
    %c1 = arith.constant 1 : index
    %c0_11 = arith.constant 0 : index
    %c0_12 = arith.constant 0 : index
    %23 = vector.load %arg2[%c1, %c0_11, %c0_12] : memref<4x128x128xbf16, #tpu.memory_space<vmem>>, vector<1x128x128xbf16>
    %24 = vector.shape_cast %23 : vector<1x128x128xbf16> to vector<128x128xbf16>
    %cst_13 = arith.constant dense<0.000000e+00> : vector<24x128xf32>
    %25 = tpu.matmul %22, %24, %cst_13 {dimension_numbers = #tpu.dot_dimension_numbers<[1], [0], [0], [1], [0, 0, 1, 1], [], []>} : vector<24x128xbf16>, vector<128x128xbf16>, vector<24x128xf32> -> vector<24x128xf32>
    %c1_14 = arith.constant 1 : index
    %c0_15 = arith.constant 0 : index
    %c0_16 = arith.constant 0 : index
    %26 = vector.load %arg3[%c1_14, %c0_15, %c0_16] : memref<4x1x128xf32, #tpu.memory_space<vmem>>, vector<1x1x128xf32>
    %27 = vector.shape_cast %26 : vector<1x1x128xf32> to vector<1x128xf32>
    %28 = vector.broadcast %27 : vector<1x128xf32> to vector<24x128xf32>
    %29 = arith.addf %25, %28 : vector<24x128xf32>
    %cst_17 = arith.constant 2.000000e-01 : f32
    %30 = vector.broadcast %cst_17 : f32 to vector<24x128xf32>
    %31 = arith.mulf %30, %29 : vector<24x128xf32>
    %32 = arith.maximumf %29, %31 : vector<24x128xf32>
    %33 = arith.truncf %32 : vector<24x128xf32> to vector<24x128xbf16>
    %c2 = arith.constant 2 : index
    %c0_18 = arith.constant 0 : index
    %c0_19 = arith.constant 0 : index
    %34 = vector.load %arg2[%c2, %c0_18, %c0_19] : memref<4x128x128xbf16, #tpu.memory_space<vmem>>, vector<1x128x128xbf16>
    %35 = vector.shape_cast %34 : vector<1x128x128xbf16> to vector<128x128xbf16>
    %cst_20 = arith.constant dense<0.000000e+00> : vector<24x128xf32>
    %36 = tpu.matmul %33, %35, %cst_20 {dimension_numbers = #tpu.dot_dimension_numbers<[1], [0], [0], [1], [0, 0, 1, 1], [], []>} : vector<24x128xbf16>, vector<128x128xbf16>, vector<24x128xf32> -> vector<24x128xf32>
    %c2_21 = arith.constant 2 : index
    %c0_22 = arith.constant 0 : index
    %c0_23 = arith.constant 0 : index
    %37 = vector.load %arg3[%c2_21, %c0_22, %c0_23] : memref<4x1x128xf32, #tpu.memory_space<vmem>>, vector<1x1x128xf32>
    %38 = vector.shape_cast %37 : vector<1x1x128xf32> to vector<1x128xf32>
    %39 = vector.broadcast %38 : vector<1x128xf32> to vector<24x128xf32>
    %40 = arith.addf %36, %39 : vector<24x128xf32>
    %cst_24 = arith.constant 2.000000e-01 : f32
    %41 = vector.broadcast %cst_24 : f32 to vector<24x128xf32>
    %42 = arith.mulf %41, %40 : vector<24x128xf32>
    %43 = arith.maximumf %40, %42 : vector<24x128xf32>
    %44 = arith.truncf %43 : vector<24x128xf32> to vector<24x128xbf16>
    %c3 = arith.constant 3 : index
    %c0_25 = arith.constant 0 : index
    %c0_26 = arith.constant 0 : index
    %45 = vector.load %arg2[%c3, %c0_25, %c0_26] : memref<4x128x128xbf16, #tpu.memory_space<vmem>>, vector<1x128x128xbf16>
    %46 = vector.shape_cast %45 : vector<1x128x128xbf16> to vector<128x128xbf16>
    %cst_27 = arith.constant dense<0.000000e+00> : vector<24x128xf32>
    %47 = tpu.matmul %44, %46, %cst_27 {dimension_numbers = #tpu.dot_dimension_numbers<[1], [0], [0], [1], [0, 0, 1, 1], [], []>} : vector<24x128xbf16>, vector<128x128xbf16>, vector<24x128xf32> -> vector<24x128xf32>
    %c3_28 = arith.constant 3 : index
    %c0_29 = arith.constant 0 : index
    %c0_30 = arith.constant 0 : index
    %48 = vector.load %arg3[%c3_28, %c0_29, %c0_30] : memref<4x1x128xf32, #tpu.memory_space<vmem>>, vector<1x1x128xf32>
    %49 = vector.shape_cast %48 : vector<1x1x128xf32> to vector<1x128xf32>
    %50 = vector.broadcast %49 : vector<1x128xf32> to vector<24x128xf32>
    %51 = arith.addf %47, %50 : vector<24x128xf32>
    %c0_31 = arith.constant 0 : index
    %c0_32 = arith.constant 0 : index
    %52 = vector.load %arg4[%c0_31, %c0_32] : memref<24x128xf32, #tpu.memory_space<vmem>>, vector<24x128xf32>
    tpu.vector_store %arg4[%c0_31, %c0_32], %51 {strides = array<i32>} : memref<24x128xf32, #tpu.memory_space<vmem>>, vector<24x128xf32>,
    return
  }
  func.func @transform_0(%arg0: i32) -> (i32, i32) {
    %c0_i32 = arith.constant 0 : i32
    %c0_i32_0 = arith.constant 0 : i32
    return %arg0, %c0_i32 : i32, i32
  }
  func.func @transform_1(%arg0: i32) -> (i32, i32, i32) {
    %c0_i32 = arith.constant 0 : i32
    %c0_i32_0 = arith.constant 0 : i32
    %c0_i32_1 = arith.constant 0 : i32
    %c0_i32_2 = arith.constant 0 : i32
    return %c0_i32, %c0_i32_0, %c0_i32_1 : i32, i32, i32
  }
  func.func @transform_2(%arg0: i32) -> (i32, i32, i32) {
    %c0_i32 = arith.constant 0 : i32
    %c0_i32_0 = arith.constant 0 : i32
    %c0_i32_1 = arith.constant 0 : i32
    %c0_i32_2 = arith.constant 0 : i32
    return %c0_i32, %c0_i32_0, %c0_i32_1 : i32, i32, i32
  }
  func.func @transform_3(%arg0: i32) -> (i32, i32) {
    %c0_i32 = arith.constant 0 : i32
    %c0_i32_0 = arith.constant 0 : i32
    return %arg0, %c0_i32 : i32, i32
  }
}

</mosaic_0001>

<bundles_post_ra>
// kernel: _mapping_base.1
= control target key start
LH: loop header
LB: loop body
LE: loop exit
PB: predicated region body
PF: predicated region fallthrough
CT: control target
= control target key end

     0   :  { %8 = vsyncpa [#allocation3], 0  ;;  %s949_s0 = inlined_call_operand.hbm [shape: f32[20,128], index: 0, kind: input, shape index: {}]   ;;  %s950_s1 = inlined_call_operand.hbm [shape: bf16[4,128,128], index: 1, kind: input, shape index: {}]   ;;  %s951_s2 = inlined_call_operand.hbm [shape: f32[4,1,128], index: 2, kind: input, shape index: {}]   ;;  %s952_s3 = inlined_call_operand.hbm [shape: f32[20,128], index: 3, kind: output, shape index: {}]  }
   0x1   :  { %9 = vsyncpa [#allocation6], 0 }
   0x2   :  { %10 = vsyncpa [#allocation4], 0  ;;  %s901_s12 = smov [#allocation5]  }
   0x3   :  { %s28_s13 = sshll.u32 %s901_s12, 4  ;;  %s29_s13 = int_to_ptr.vmem [resolvable:$true] %s28_s13 }
   0x4   :  { %s823_s14 = scalar_lea.vmem %s29_s13, 4096  ;;  %p828_p1 = scmp.lt.s32.totalorder %s29_s13, %s29_s13 }
   0x5   :  { %p824_p0 = scmp.ne.s32.totalorder %s29_s13, %s823_s14  ;;  %p829_p2 = scmp.lt.s32.totalorder %s823_s14, %s823_s14 }
   0x7   :  { %p830_p3 = por %p829_p2, %p828_p1 }
   0x9   :  { %p831_p4 = pnand %p830_p3, %p824_p0 }
   0xb   :  { %834 = shalt.err (!%p831_p4)
}
   0xc   :  { %s902_s15 = smov 64   ;;  %s903_s16 = smov 4  }
   0xd   :  { %34 = dma.hbm_to_vmem [thread:$0]  %s950_s1, 4096, %s29_s13, [#allocation6], %s902_s15, %s902_s15, %s903_s16  }
   0xe   :  { %s904_s19 = smov [#allocation2]  }
   0xf   :  { %s16_s20 = sshll.u32 %s904_s19, 4  ;;  %s17_s20 = int_to_ptr.vmem [resolvable:$true] %s16_s20 }
  0x10   :  { %s843_s21 = scalar_lea.vmem %s17_s20, 384  ;;  %p848_p6 = scmp.lt.s32.totalorder %s17_s20, %s17_s20 }
  0x11   :  { %p844_p5 = scmp.ne.s32.totalorder %s17_s20, %s843_s21  ;;  %p849_p7 = scmp.lt.s32.totalorder %s843_s21, %s843_s21 }
  0x13   :  { %p850_p8 = por %p849_p7, %p848_p6 }
  0x15   :  { %p851_p9 = pnand %p850_p8, %p844_p5 }
  0x17   :  { %854 = shalt.err (!%p851_p9)
}
  0x18   :  { %s905_s22 = smov 128   ;;  %s906_s23 = smov 8  }
  0x19   :  { %22 = dma.hbm_to_vmem [thread:$0]  %s949_s0, 384, %s17_s20, [#allocation3], %s905_s22, %s905_s22, %s906_s23  }
  0x1a   :  { %s907_s1 = smov [#allocation7]  }
  0x1b   :  { %s40_s26 = sshll.u32 %s907_s1, 4  ;;  %s41_s26 = int_to_ptr.vmem [resolvable:$true] %s40_s26 }
  0x1c   :  { %s863_s27 = scalar_lea.vmem %s41_s26, 64  ;;  %p868_p11 = scmp.lt.s32.totalorder %s41_s26, %s41_s26 }
  0x1d   :  { %p864_p10 = scmp.ne.s32.totalorder %s41_s26, %s863_s27  ;;  %p869_p12 = scmp.lt.s32.totalorder %s863_s27, %s863_s27 }
  0x1f   :  { %p870_p13 = por %p869_p12, %p868_p11 }
  0x21   :  { %p871_p0 = pnand %p870_p13, %p864_p10 }
  0x23   :  { %874 = shalt.err (!%p871_p0)
}
  0x24   :  { %s908_s28 = smov 16   ;;  %s909_s29 = smov 1  }
  0x25   :  { %46 = dma.hbm_to_vmem [thread:$0]  %s951_s2, 64, %s41_s26, [#allocation6], %s908_s28, %s908_s28, %s909_s29  }
  0x26   :  { %895 = dma.done.wait [#allocation3], 384  }
  0x27   :  { %896 = vsyncadd [#allocation3], 4294966912 }
  0x28   :  { %897 = dma.done.wait [#allocation6], 4160  }
  0x29   :  { %898 = vsyncadd [#allocation6], 4294963136  ;;  %v57_v0 = vld [vmem:[#allocation2] sm:$0xff]  ;;  %v58_v1 = vld [vmem:[#allocation2 + $0x8] sm:$0xff]  ;;  %s910_s0 = smov [#allocation8]  }
  0x2a   :  { %v59_v2 = vld [vmem:[#allocation2 + $0x10] sm:$0xff]  ;;  %v60_v3 = vmul.f32 %v57_v0, %v57_v0  ;;  %v778_v6 = vld [vmem:[#allocation5 + $0x30] sm:$0xff]   ;;  %v61_v7 = vmul.f32 %v58_v1, %v58_v1  ;;  %v779_v8 = vld [vmem:[#allocation5 + $0x28] sm:$0xff]   ;;  %s598_s2 = sshll.u32 %s910_s0, 4  ;;  %s599_s2 = int_to_ptr.vmem [resolvable:$true] %s598_s2 }
  0x2b   :  { %v62_v4 = vmul.f32 %v59_v2, %v59_v2  ;;  %v777_v5 = vld [vmem:[#allocation5 + $0x38] sm:$0xff]   ;;  %v780_v9 = vld [vmem:[#allocation5 + $0x20] sm:$0xff]   ;;  %v782_v11 = vld [vmem:[#allocation5 + $0x10] sm:$0xff]   ;;  %s875_s5 = scalar_lea.vmem %s599_s2, 384  ;;  %p880_p2 = scmp.lt.s32.totalorder %s599_s2, %s599_s2 }
  0x2c   :  { %63 = vadd.xlane.f32.xlu0 %v60_v3  ;;  %687 = vmatprep.subr.bf16.mxu0 %v777_v5  ;;  %v781_v10 = vld [vmem:[#allocation5 + $0x18] sm:$0xff]   ;;  %v783_v12 = vld [vmem:[#allocation5 + $0x8] sm:$0xff]   ;;  %v784_v13 = vld [vmem:[#allocation5] sm:$0xff]   ;;  %p876_p1 = scmp.ne.s32.totalorder %s599_s2, %s875_s5  ;;  %p881_p3 = scmp.lt.s32.totalorder %s875_s5, %s875_s5 }
  0x2d   :  { %67 = vadd.xlane.f32.xlu1 %v62_v4  ;;  %688 = vmatpush3.bf16.msra.mxu0 %v777_v5  ;;  %v785_v14 = vld [vmem:[#allocation5 + $0x78] sm:$0xff]   ;;  %v786_v15 = vld [vmem:[#allocation5 + $0x70] sm:$0xff]   ;;  %v787_v16 = vld [vmem:[#allocation5 + $0x68] sm:$0xff]  }
  0x2e   :  { %689 = vmatprep.subr.bf16.mxu0 %v778_v6  ;;  %707 = vmatprep.subr.bf16.mxu1 %v785_v14  ;;  %v788_v17 = vld [vmem:[#allocation5 + $0x60] sm:$0xff]   ;;  %v789_v35 = vld [vmem:[#allocation5 + $0x58] sm:$0xff]   ;;  %v790_v36 = vld [vmem:[#allocation5 + $0x50] sm:$0xff]   ;;  %p882_p4 = por %p881_p3, %p880_p2 }
  0x2f   :  { %708 = vmatpush3.bf16.msra.mxu1 %v785_v14  ;;  %v791_v37 = vld [vmem:[#allocation5 + $0x48] sm:$0xff]   ;;  %v792_v38 = vld [vmem:[#allocation5 + $0x40] sm:$0xff]   ;;  %v793_v39 = vld [vmem:[#allocation5 + $0xb8] sm:$0xff]  }
  0x30   :  { %65 = vadd.xlane.f32.xlu0 %v61_v7  ;;  %709 = vmatprep.subr.bf16.mxu1 %v786_v15  ;;  %v794_v40 = vld [vmem:[#allocation5 + $0xb0] sm:$0xff]   ;;  %v795_v41 = vld [vmem:[#allocation5 + $0xa8] sm:$0xff]   ;;  %v796_v42 = vld [vmem:[#allocation5 + $0xa0] sm:$0xff]   ;;  %p883_p5 = pnand %p882_p4, %p876_p1 }
  0x31   :  { %690 = vmatpush3.bf16.msra.mxu0 %v778_v6  ;;  %v611_v43 = vld [vmem:[#allocation7] ss:$0 sm:$0xff]  ;;  %v797_v59 = vld [vmem:[#allocation5 + $0x98] sm:$0xff]   ;;  %v798_v60 = vld [vmem:[#allocation5 + $0x90] sm:$0xff]  }
  0x32   :  { %691 = vmatprep.subr.bf16.mxu0 %v779_v8  ;;  %v799_v61 = vld [vmem:[#allocation5 + $0x88] sm:$0xff]   ;;  %v800_v62 = vld [vmem:[#allocation5 + $0x80] sm:$0xff]   ;;  %v801_v63 = vld [vmem:[#allocation5 + $0xf8] sm:$0xff]  }
  0x33   :  { %710 = vmatpush3.bf16.msra.mxu1 %v786_v15  ;;  %v620_v3 = vld [vmem:[#allocation7 + $0x1] ss:$0 sm:$0xff] }
  0x34   :  { %711 = vmatprep.subr.bf16.mxu1 %v787_v16 }
  0x35   :  { %692 = vmatpush3.bf16.msra.mxu0 %v779_v8 }
  0x36   :  { %693 = vmatprep.subr.bf16.mxu0 %v780_v9 }
  0x37   :  { %712 = vmatpush3.bf16.msra.mxu1 %v787_v16 }
  0x38   :  { %713 = vmatprep.subr.bf16.mxu1 %v788_v17 }
  0x39   :  { %694 = vmatpush3.bf16.msra.mxu0 %v780_v9 }
  0x3a   :  { %695 = vmatprep.subr.bf16.mxu0 %v781_v10 }
  0x3b   :  { %714 = vmatpush3.bf16.msra.mxu1 %v788_v17 }
  0x3c   :  { %715 = vmatprep.subr.bf16.mxu1 %v789_v35 }
  0x3d   :  { %696 = vmatpush3.bf16.msra.mxu0 %v781_v10 }
  0x3e   :  { %697 = vmatprep.subr.bf16.mxu0 %v782_v11 }
  0x3f   :  { %716 = vmatpush3.bf16.msra.mxu1 %v789_v35 }
  0x40   :  { %717 = vmatprep.subr.bf16.mxu1 %v790_v36 }
  0x41   :  { %698 = vmatpush3.bf16.msra.mxu0 %v782_v11 }
  0x42   :  { %699 = vmatprep.subr.bf16.mxu0 %v783_v12 }
  0x43   :  { %718 = vmatpush3.bf16.msra.mxu1 %v790_v36 }
  0x44   :  { %719 = vmatprep.subr.bf16.mxu1 %v791_v37 }
  0x45   :  { %700 = vmatpush3.bf16.msra.mxu0 %v783_v12 }
  0x46   :  { %701 = vmatprep.subr.bf16.mxu0 %v784_v13 }
  0x47   :  { %720 = vmatpush3.bf16.msra.mxu1 %v791_v37 }
  0x48   :  { %721 = vmatprep.subr.bf16.mxu1 %v792_v38 }
  0x49   :  { %702 = vmatpush3.bf16.msra.mxu0 %v784_v13 }
  0x4a   :  { %727 = vmatprep.subr.bf16.mxu0 %v793_v39 }
  0x4b   :  { %722 = vmatpush3.bf16.msra.mxu1 %v792_v38 }
  0x4c   :  { %747 = vmatprep.subr.bf16.mxu1 %v801_v63 }
  0xb5   :  { %v64_v18 = vpop.xlane.xlu0 %63 }
  0xb6   :  { %v68_v19 = vpop.xlane.xlu1 %67  ;;  %v70_v20 = vmul.f32 0.0078125, %v64_v18 }
  0xb7   :  { %v72_v21 = vmul.f32 0.0078125, %v68_v19  ;;  %v805_v19 = vld [vmem:[#allocation5 + $0xd8] sm:$0xff]  }
  0xb8   :  { %v73_v22 = vadd.f32 1e-08, %v70_v20  ;;  %v806_v20 = vld [vmem:[#allocation5 + $0xd0] sm:$0xff]  }
  0xb9   :  { %v75_v23 = vadd.f32 1e-08, %v72_v21  ;;  %v66_v24 = vpop.xlane.xlu0 %65  ;;  %v807_v21 = vld [vmem:[#allocation5 + $0xc8] sm:$0xff]  }
  0xba   :  { %v71_v25 = vmul.f32 0.0078125, %v66_v24 }
  0xbb   :  { %809 = vrsqrt.f32 %v75_v23  ;;  %v629_v23 = vld [vmem:[#allocation7 + $0x2] ss:$0 sm:$0xff] }
  0xbc   :  { %811 = vrsqrt.f32 %v73_v22  ;;  %v74_v26 = vadd.f32 1e-08, %v71_v25  ;;  %v808_v22 = vld [vmem:[#allocation5 + $0xc0] sm:$0xff]  }
  0xbe   :  { %813 = vrsqrt.f32 %v74_v26 }
  0xc8   :  { %v810_v27 = vpop.eup %809 }
  0xc9   :  { %v812_v28 = vpop.eup %811  ;;  %v81_v29 = vmul.f32 %v810_v27, %v59_v2  ;;  %v804_v2 = vld [vmem:[#allocation5 + $0xe0] sm:$0xff]  }
  0xca   :  { %v79_v31 = vmul.f32 %v812_v28, %v57_v0  ;;  %v802_v0 = vld [vmem:[#allocation5 + $0xf0] sm:$0xff]  }
  0xcb   :  { %v814_v30 = vpop.eup %813  ;;  %v83_v33 = vpack.c.bf16 %v81_v29, %v81_v29 }
  0xcc   :  { %v80_v32 = vmul.f32 %v814_v30, %v58_v1  ;;  %v803_v1 = vld [vmem:[#allocation5 + $0xe8] sm:$0xff]  }
  0xce   :  { %v82_v34 = vpack.c.bf16 %v80_v32, %v79_v31 }
  0xd0   :  { %703 = vmatprep.mubr.bf16.mxu0 %v82_v34 }
  0xd1   :  { %704 = vmatmul.mubr.bf16.vlgmr.msra.gmra.mxu0 %v83_v33 }
  0xd2   :  { %728 = vmatpush3.bf16.msra.mxu0 %v793_v39  ;;  %v638_v39 = vld [vmem:[#allocation7 + $0x3] ss:$0 sm:$0xff] }
  0xd3   :  { %729 = vmatprep.subr.bf16.mxu0 %v794_v40 }
  0xd6   :  { %730 = vmatpush3.bf16.msra.mxu0 %v794_v40 }
  0xd7   :  { %731 = vmatprep.subr.bf16.mxu0 %v795_v41 }
  0xda   :  { %732 = vmatpush3.bf16.msra.mxu0 %v795_v41 }
  0xdb   :  { %733 = vmatprep.subr.bf16.mxu0 %v796_v42 }
  0xde   :  { %734 = vmatpush3.bf16.msra.mxu0 %v796_v42 }
  0xdf   :  { %735 = vmatprep.subr.bf16.mxu0 %v797_v59 }
  0xe2   :  { %736 = vmatpush3.bf16.msra.mxu0 %v797_v59 }
  0xe3   :  { %737 = vmatprep.subr.bf16.mxu0 %v798_v60 }
  0xe6   :  { %738 = vmatpush3.bf16.msra.mxu0 %v798_v60 }
  0xe7   :  { %739 = vmatprep.subr.bf16.mxu0 %v799_v61 }
  0xea   :  { %740 = vmatpush3.bf16.msra.mxu0 %v799_v61 }
  0xeb   :  { %741 = vmatprep.subr.bf16.mxu0 %v800_v62 }
  0xee   :  { %742 = vmatpush3.bf16.msra.mxu0 %v800_v62 }
 0x191   :  { %v705_v44 = vpop.f32.mrf.mxu0 }
 0x192   :  { %v198_v45 = vadd.f32 %v705_v44, %v611_v43 }
 0x193   :  { %v189_v46 = vpop.f32.mrf.mxu0 }
 0x194   :  { %v190_v47 = vadd.f32 %v611_v43, %v189_v46  ;;  %v205_v49 = vmul.f32 0.2, %v198_v45 }
 0x195   :  { %v706_v48 = vpop.f32.mrf.mxu0 }
 0x196   :  { %v203_v51 = vmul.f32 0.2, %v190_v47  ;;  %v208_v54 = vmax.f32 %v198_v45, %v205_v49 }
 0x197   :  { %v192_v50 = vpop.f32.mrf.mxu0 }
 0x198   :  { %v193_v52 = vadd.f32 %v611_v43, %v192_v50  ;;  %v206_v55 = vmax.f32 %v190_v47, %v203_v51  ;;  %v210_v58 = vpack.c.bf16 %v208_v54, %v208_v54 }
 0x19a   :  { %v204_v53 = vmul.f32 0.2, %v193_v52 }
 0x19c   :  { %v207_v56 = vmax.f32 %v193_v52, %v204_v53 }
 0x19e   :  { %v209_v57 = vpack.c.bf16 %v207_v56, %v206_v55 }
 0x1a0   :  { %723 = vmatprep.mubr.bf16.mxu1 %v209_v57 }
 0x1a1   :  { %724 = vmatmul.mubr.bf16.vlgmr.msra.gmra.mxu1 %v210_v58 }
 0x1a2   :  { %748 = vmatpush3.bf16.msra.mxu1 %v801_v63 }
 0x1a3   :  { %749 = vmatprep.subr.bf16.mxu1 %v802_v0 }
 0x1a6   :  { %750 = vmatpush3.bf16.msra.mxu1 %v802_v0 }
 0x1a7   :  { %751 = vmatprep.subr.bf16.mxu1 %v803_v1 }
 0x1aa   :  { %752 = vmatpush3.bf16.msra.mxu1 %v803_v1 }
 0x1ab   :  { %753 = vmatprep.subr.bf16.mxu1 %v804_v2 }
 0x1ae   :  { %754 = vmatpush3.bf16.msra.mxu1 %v804_v2 }
 0x1af   :  { %755 = vmatprep.subr.bf16.mxu1 %v805_v19 }
 0x1b2   :  { %756 = vmatpush3.bf16.msra.mxu1 %v805_v19 }
 0x1b3   :  { %757 = vmatprep.subr.bf16.mxu1 %v806_v20 }
 0x1b6   :  { %758 = vmatpush3.bf16.msra.mxu1 %v806_v20 }
 0x1b7   :  { %759 = vmatprep.subr.bf16.mxu1 %v807_v21 }
 0x1ba   :  { %760 = vmatpush3.bf16.msra.mxu1 %v807_v21 }
 0x1bb   :  { %761 = vmatprep.subr.bf16.mxu1 %v808_v22 }
 0x1be   :  { %762 = vmatpush3.bf16.msra.mxu1 %v808_v22 }
 0x261   :  { %v725_v4 = vpop.f32.mrf.mxu1 }
 0x262   :  { %v327_v5 = vadd.f32 %v725_v4, %v620_v3 }
 0x263   :  { %v318_v6 = vpop.f32.mrf.mxu1 }
 0x264   :  { %v319_v7 = vadd.f32 %v620_v3, %v318_v6  ;;  %v334_v9 = vmul.f32 0.2, %v327_v5 }
 0x265   :  { %v726_v8 = vpop.f32.mrf.mxu1 }
 0x266   :  { %v332_v11 = vmul.f32 0.2, %v319_v7  ;;  %v337_v14 = vmax.f32 %v327_v5, %v334_v9 }
 0x267   :  { %v321_v10 = vpop.f32.mrf.mxu1 }
 0x268   :  { %v322_v12 = vadd.f32 %v620_v3, %v321_v10  ;;  %v335_v15 = vmax.f32 %v319_v7, %v332_v11  ;;  %v339_v18 = vpack.c.bf16 %v337_v14, %v337_v14 }
 0x26a   :  { %v333_v13 = vmul.f32 0.2, %v322_v12 }
 0x26c   :  { %v336_v16 = vmax.f32 %v322_v12, %v333_v13 }
 0x26e   :  { %v338_v17 = vpack.c.bf16 %v336_v16, %v335_v15 }
 0x270   :  { %743 = vmatprep.mubr.bf16.mxu0 %v338_v17 }
 0x271   :  { %744 = vmatmul.mubr.bf16.vlgmr.msra.gmra.mxu0 %v339_v18 }
 0x331   :  { %v745_v24 = vpop.f32.mrf.mxu0 }
 0x332   :  { %v456_v25 = vadd.f32 %v745_v24, %v629_v23 }
 0x333   :  { %v447_v26 = vpop.f32.mrf.mxu0 }
 0x334   :  { %v448_v27 = vadd.f32 %v629_v23, %v447_v26  ;;  %v463_v29 = vmul.f32 0.2, %v456_v25 }
 0x335   :  { %v746_v28 = vpop.f32.mrf.mxu0 }
 0x336   :  { %v461_v31 = vmul.f32 0.2, %v448_v27  ;;  %v466_v34 = vmax.f32 %v456_v25, %v463_v29 }
 0x337   :  { %v450_v30 = vpop.f32.mrf.mxu0 }
 0x338   :  { %v451_v32 = vadd.f32 %v629_v23, %v450_v30  ;;  %v464_v35 = vmax.f32 %v448_v27, %v461_v31  ;;  %v468_v38 = vpack.c.bf16 %v466_v34, %v466_v34 }
 0x33a   :  { %v462_v33 = vmul.f32 0.2, %v451_v32 }
 0x33c   :  { %v465_v36 = vmax.f32 %v451_v32, %v462_v33 }
 0x33e   :  { %v467_v37 = vpack.c.bf16 %v465_v36, %v464_v35 }
 0x340   :  { %763 = vmatprep.mubr.bf16.mxu1 %v467_v37 }
 0x341   :  { %764 = vmatmul.mubr.bf16.vlgmr.msra.gmra.mxu1 %v468_v38 }
 0x401   :  { %v765_v40 = vpop.f32.mrf.mxu1 }
 0x402   :  { %v585_v41 = vadd.f32 %v765_v40, %v638_v39 }
 0x403   :  { %v576_v42 = vpop.f32.mrf.mxu1 }
 0x404   :  { %592 = vst [vmem:[#allocation8 + $0x10] sm:$0xff] %v585_v41  ;;  %v577_v43 = vadd.f32 %v638_v39, %v576_v42 }
 0x405   :  { %v766_v44 = vpop.f32.mrf.mxu1 }
 0x406   :  { %590 = vst [vmem:[#allocation8] sm:$0xff] %v577_v43 }
 0x407   :  { %v579_v45 = vpop.f32.mrf.mxu1 }
 0x408   :  { %v580_v46 = vadd.f32 %v638_v39, %v579_v45 }
 0x40a   :  { %591 = vst [vmem:[#allocation8 + $0x8] sm:$0xff] %v580_v46 }
 0x40b   :  { %886 = shalt.err (!%p883_p5)
}
 0x40c   :  { %604 = dma.vmem_to_hbm [thread:$0]  %s599_s2, 384, %s952_s3, [#allocation4], %s905_s22, %s905_s22, %s906_s23  }
 0x40d   :  { %899 = dma.done.wait [#allocation4], 384  }
 0x40e   :  { %900 = vsyncadd [#allocation4], 4294966912 }
 0x40f   :  { %608 = vsyncpa [#allocation3], 1 }
 0x410   :  { %609 = vsyncpa [#allocation6], 1 }
 0x411   :  { %610 = vsyncpa [#allocation4], 1 }

</bundles_post_ra>
